<compile_context>
chip_gen: v7x
topology: tpu7x:2x2x1
jax: 0.10.0
libtpu: 0.0.40
codegen_flags: <defaults>
</compile_context>

<pallas_src>
import functools

import jax
import jax.numpy as jnp
from jax.experimental import pallas as pl
from jax.experimental.pallas import tpu as pltpu

_LANE = 128
_SUBLANE = 8


def _round_up(x, m):
    return ((x + m - 1) // m) * m


def _actor_kernel(x_ref, w1_ref, b1_ref, w2_ref, b2_ref, w3_ref, b3_ref,
                  mean_ref, *, mxu_dtype):
    # Cast the activation to the MXU operand dtype on the VPU (hidden under
    # DMA/MXU slack) instead of paying an extra HBM pass in the wrapper.
    x = x_ref[...].astype(mxu_dtype)
    # Layer 1: Linear + ReLU (MXU matmul, f32 accumulate, f32 epilogue).
    h = jnp.dot(x, w1_ref[...], preferred_element_type=jnp.float32)
    h = jnp.maximum(h + b1_ref[...], 0.0)
    # Layer 2: Linear + ReLU.
    h = jnp.dot(h.astype(mxu_dtype), w2_ref[...],
                preferred_element_type=jnp.float32)
    h = jnp.maximum(h + b2_ref[...], 0.0)
    # Output layer: Linear (action mean), unpadded lane width == action_dim.
    mean = jnp.dot(h.astype(mxu_dtype), w3_ref[...],
                   preferred_element_type=jnp.float32)
    mean_ref[...] = (mean + b3_ref[...]).astype(mean_ref.dtype)


def actor_forward(state, params, *, block_batch=2048, mxu_dtype=jnp.bfloat16,
                  pallas_min_batch=0):
    """Fused actor MLP forward. Returns (action_mean, action_std) arrays."""
    w1, b1, w2, b2, w3, b3, action_std = params
    batch, state_dim = state.shape
    h0, h1 = w1.shape[1], w2.shape[1]
    action_dim = w3.shape[1]

    std = jnp.broadcast_to(action_std.reshape(1, action_dim),
                           (batch, action_dim))

    # Tiny-batch escape hatch: at grid==1-ish sizes plain XLA fusion beats the
    # fixed pallas_call/DMA setup cost. Default 0 so the kernel path is the
    # default; raise (e.g. to 256) in latency-critical rollout loops.
    if batch < pallas_min_batch:
        h = jnp.maximum(state @ w1 + b1.reshape(1, -1), 0.0)
        h = jnp.maximum(h @ w2 + b2.reshape(1, -1), 0.0)
        return h @ w3 + b3.reshape(1, -1), std

    # Zero-pad hidden dims to full 128-lane width (exact: ReLU(0 + 0) = 0 and
    # zero weight rows contribute nothing downstream). Weights are cast to the
    # MXU dtype here since they are resident; biases stay f32.
    h0p, h1p = _round_up(h0, _LANE), _round_up(h1, _LANE)
    w1p = jnp.zeros((state_dim, h0p), mxu_dtype).at[:, :h0].set(
        w1.astype(mxu_dtype))
    b1p = jnp.zeros((1, h0p), jnp.float32).at[:, :h0].set(b1.reshape(1, h0))
    w2p = jnp.zeros((h0p, h1p), mxu_dtype).at[:h0, :h1].set(
        w2.astype(mxu_dtype))
    b2p = jnp.zeros((1, h1p), jnp.float32).at[:, :h1].set(b2.reshape(1, h1))
    w3p = jnp.zeros((h1p, action_dim), mxu_dtype).at[:h1, :].set(
        w3.astype(mxu_dtype))
    b3p = b3.reshape(1, action_dim).astype(jnp.float32)

    # Batch tile: big (amortizes ~0.35us/step overhead), sublane-aligned, and
    # capped so large batches always yield >= 2 grid steps (v7x megacore).
    rows = _round_up(batch, _SUBLANE)
    tb = min(block_batch, rows)
    if rows >= 1024:
        tb = min(tb, _round_up(pl.cdiv(rows, 2), _SUBLANE))
    grid = (pl.cdiv(batch, tb),)

    def resident(a):
        return pl.BlockSpec(a.shape, lambda i: (0,) * a.ndim)

    flops = 2 * batch * (state_dim * h0p + h0p * h1p + h1p * action_dim)
    bytes_accessed = (
        state.size * state.dtype.itemsize
        + sum(a.size * a.dtype.itemsize
              for a in (w1p, b1p, w2p, b2p, w3p, b3p))
        + batch * action_dim * 4)

    mean = pl.pallas_call(
        functools.partial(_actor_kernel, mxu_dtype=mxu_dtype),
        out_shape=jax.ShapeDtypeStruct((batch, action_dim), jnp.float32),
        grid=grid,
        in_specs=[
            pl.BlockSpec((tb, state_dim), lambda i: (i, 0)),  # pipelined batch
            resident(w1p), resident(b1p),
            resident(w2p), resident(b2p),
            resident(w3p), resident(b3p),
        ],
        out_specs=pl.BlockSpec((tb, action_dim), lambda i: (i, 0)),
        compiler_params=pltpu.CompilerParams(
            dimension_semantics=("parallel",)),
        cost_estimate=pl.CostEstimate(flops=flops, transcendentals=0,
                                      bytes_accessed=bytes_accessed),
    )(state, w1p, b1p, w2p, b2p, w3p, b3p)

    return mean, std


def init_params(key, state_dim, hidden_dims, action_dim, action_std_init):
    """Deterministic synthetic parameters (PyTorch-style uniform fan-in init)."""
    dims = [state_dim] + list(hidden_dims) + [action_dim]
    params = []
    for i in range(len(dims) - 1):
        key, kw, kb = jax.random.split(key, 3)
        fan_in, fan_out = dims[i], dims[i + 1]
        bound = 1.0 / jnp.sqrt(fan_in)
        # weight stored as (in_dim, out_dim) == transpose of torch Linear.weight
        w = jax.random.uniform(kw, (fan_in, fan_out), jnp.float32, -bound, bound)
        b = jax.random.uniform(kb, (1, fan_out), jnp.float32, -bound, bound)
        params.extend([w, b])
    action_std = jnp.ones((action_dim,), jnp.float32) * action_std_init
    params.append(action_std)
    return params


if __name__ == "__main__":
    key = jax.random.PRNGKey(0)

    batch = 8
    state_dim = 32
    hidden_dims = (64, 64)
    action_dim = 8
    action_std_init = 0.6

    key, kx = jax.random.split(key)
    state = jax.random.normal(kx, (batch, state_dim), jnp.float32)
    params = init_params(key, state_dim, hidden_dims, action_dim,
                         action_std_init)

    # Reference in plain JAX.
    w1, b1, w2, b2, w3, b3, a_std = params
    h = jnp.maximum(state @ w1 + b1, 0.0)
    h = jnp.maximum(h @ w2 + b2, 0.0)
    ref_mean = h @ w3 + b3
    ref_std = jnp.broadcast_to(a_std.reshape(1, action_dim),
                               (batch, action_dim))

    # Tight correctness check with f32 MXU operands.
    fwd_f32 = jax.jit(functools.partial(actor_forward, mxu_dtype=jnp.float32))
    mean32, std32 = fwd_f32(state, params)
    jax.block_until_ready((mean32, std32))
    assert jnp.allclose(mean32, ref_mean, atol=1e-5), "f32 mean mismatch"
    assert jnp.allclose(std32, ref_std, atol=1e-6), "std mismatch"

    # Default throughput config: bf16 MXU operands, f32 accumulation.
    fwd = jax.jit(actor_forward)
    mean, std = fwd(state, params)
    jax.block_until_ready((mean, std))
    assert jnp.allclose(mean, ref_mean, atol=5e-2, rtol=5e-2), \
        "bf16 mean mismatch"
    assert jnp.allclose(std, ref_std, atol=1e-6), "std mismatch"

    print("KERNEL_OK")
</pallas_src>

<mosaic_0001>
module attributes {stable_mosaic.version = 11 : i64} {
  func.func @_actor_kernel(%arg0: i32, %arg1: memref<8x32xf32, #tpu.memory_space<vmem>>, %arg2: memref<32x128xf32, #tpu.memory_space<vmem>>, %arg3: memref<1x128xf32, #tpu.memory_space<vmem>>, %arg4: memref<128x128xf32, #tpu.memory_space<vmem>>, %arg5: memref<1x128xf32, #tpu.memory_space<vmem>>, %arg6: memref<128x8xf32, #tpu.memory_space<vmem>>, %arg7: memref<1x8xf32, #tpu.memory_space<vmem>>, %arg8: memref<8x8xf32, #tpu.memory_space<vmem>>) attributes {dimension_semantics = [#tpu.dimension_semantics<parallel>], iteration_bounds = array<i64: 1>, scalar_prefetch = 0 : i64, scratch_operands = 0 : i64, tpu.core_type = #tpu.core_type<tc>, window_params = [{transform_indices = @transform_0, window_bounds = array<i64: 8, 32>}, {pipeline_mode = #tpu.pipeline_mode<synchronous>, transform_indices = @transform_1, window_bounds = array<i64: 32, 128>}, {pipeline_mode = #tpu.pipeline_mode<synchronous>, transform_indices = @transform_2, window_bounds = array<i64: 1, 128>}, {pipeline_mode = #tpu.pipeline_mode<synchronous>, transform_indices = @transform_3, window_bounds = array<i64: 128, 128>}, {pipeline_mode = #tpu.pipeline_mode<synchronous>, transform_indices = @transform_4, window_bounds = array<i64: 1, 128>}, {pipeline_mode = #tpu.pipeline_mode<synchronous>, transform_indices = @transform_5, window_bounds = array<i64: 128, 8>}, {pipeline_mode = #tpu.pipeline_mode<synchronous>, transform_indices = @transform_6, window_bounds = array<i64: 1, 8>}, {transform_indices = @transform_7, window_bounds = array<i64: 8, 8>}]} {
    %c0 = arith.constant 0 : index
    %c0_0 = arith.constant 0 : index
    %0 = vector.load %arg1[%c0, %c0_0] : memref<8x32xf32, #tpu.memory_space<vmem>>, vector<8x32xf32>
    %c0_1 = arith.constant 0 : index
    %c0_2 = arith.constant 0 : index
    %1 = vector.load %arg2[%c0_1, %c0_2] : memref<32x128xf32, #tpu.memory_space<vmem>>, vector<32x128xf32>
    %cst = arith.constant dense<0.000000e+00> : vector<8x128xf32>
    %2 = tpu.matmul %0, %1, %cst {dimension_numbers = #tpu.dot_dimension_numbers<[1], [0], [0], [1], [0, 0, 1, 1], [], []>} : vector<8x32xf32>, vector<32x128xf32>, vector<8x128xf32> -> vector<8x128xf32>
    %c0_3 = arith.constant 0 : index
    %c0_4 = arith.constant 0 : index
    %3 = vector.load %arg3[%c0_3, %c0_4] : memref<1x128xf32, #tpu.memory_space<vmem>>, vector<1x128xf32>
    %4 = vector.broadcast %3 : vector<1x128xf32> to vector<8x128xf32>
    %5 = arith.addf %2, %4 : vector<8x128xf32>
    %cst_5 = arith.constant 0.000000e+00 : f32
    %6 = vector.broadcast %cst_5 : f32 to vector<8x128xf32>
    %7 = arith.maximumf %5, %6 : vector<8x128xf32>
    %c0_6 = arith.constant 0 : index
    %c0_7 = arith.constant 0 : index
    %8 = vector.load %arg4[%c0_6, %c0_7] : memref<128x128xf32, #tpu.memory_space<vmem>>, vector<128x128xf32>
    %cst_8 = arith.constant dense<0.000000e+00> : vector<8x128xf32>
    %9 = tpu.matmul %7, %8, %cst_8 {dimension_numbers = #tpu.dot_dimension_numbers<[1], [0], [0], [1], [0, 0, 1, 1], [], []>} : vector<8x128xf32>, vector<128x128xf32>, vector<8x128xf32> -> vector<8x128xf32>
    %c0_9 = arith.constant 0 : index
    %c0_10 = arith.constant 0 : index
    %10 = vector.load %arg5[%c0_9, %c0_10] : memref<1x128xf32, #tpu.memory_space<vmem>>, vector<1x128xf32>
    %11 = vector.broadcast %10 : vector<1x128xf32> to vector<8x128xf32>
    %12 = arith.addf %9, %11 : vector<8x128xf32>
    %cst_11 = arith.constant 0.000000e+00 : f32
    %13 = vector.broadcast %cst_11 : f32 to vector<8x128xf32>
    %14 = arith.maximumf %12, %13 : vector<8x128xf32>
    %c0_12 = arith.constant 0 : index
    %c0_13 = arith.constant 0 : index
    %15 = vector.load %arg6[%c0_12, %c0_13] : memref<128x8xf32, #tpu.memory_space<vmem>>, vector<128x8xf32>
    %cst_14 = arith.constant dense<0.000000e+00> : vector<8x8xf32>
    %16 = tpu.matmul %14, %15, %cst_14 {dimension_numbers = #tpu.dot_dimension_numbers<[1], [0], [0], [1], [0, 0, 1, 1], [], []>} : vector<8x128xf32>, vector<128x8xf32>, vector<8x8xf32> -> vector<8x8xf32>
    %c0_15 = arith.constant 0 : index
    %c0_16 = arith.constant 0 : index
    %17 = vector.load %arg7[%c0_15, %c0_16] : memref<1x8xf32, #tpu.memory_space<vmem>>, vector<1x8xf32>
    %18 = vector.broadcast %17 : vector<1x8xf32> to vector<8x8xf32>
    %19 = arith.addf %16, %18 : vector<8x8xf32>
    %c0_17 = arith.constant 0 : index
    %c0_18 = arith.constant 0 : index
    %20 = vector.load %arg8[%c0_17, %c0_18] : memref<8x8xf32, #tpu.memory_space<vmem>>, vector<8x8xf32>
    tpu.vector_store %arg8[%c0_17, %c0_18], %19 {strides = array<i32>} : memref<8x8xf32, #tpu.memory_space<vmem>>, vector<8x8xf32>,
    return
  }
  func.func @transform_0(%arg0: i32) -> (i32, i32) {
    %c0_i32 = arith.constant 0 : i32
    %c0_i32_0 = arith.constant 0 : i32
    return %arg0, %c0_i32 : i32, i32
  }
  func.func @transform_1(%arg0: i32) -> (i32, i32) {
    %c0_i32 = arith.constant 0 : i32
    %c0_i32_0 = arith.constant 0 : i32
    %c0_i32_1 = arith.constant 0 : i32
    return %c0_i32, %c0_i32_0 : i32, i32
  }
  func.func @transform_2(%arg0: i32) -> (i32, i32) {
    %c0_i32 = arith.constant 0 : i32
    %c0_i32_0 = arith.constant 0 : i32
    %c0_i32_1 = arith.constant 0 : i32
    return %c0_i32, %c0_i32_0 : i32, i32
  }
  func.func @transform_3(%arg0: i32) -> (i32, i32) {
    %c0_i32 = arith.constant 0 : i32
    %c0_i32_0 = arith.constant 0 : i32
    %c0_i32_1 = arith.constant 0 : i32
    return %c0_i32, %c0_i32_0 : i32, i32
  }
  func.func @transform_4(%arg0: i32) -> (i32, i32) {
    %c0_i32 = arith.constant 0 : i32
    %c0_i32_0 = arith.constant 0 : i32
    %c0_i32_1 = arith.constant 0 : i32
    return %c0_i32, %c0_i32_0 : i32, i32
  }
  func.func @transform_5(%arg0: i32) -> (i32, i32) {
    %c0_i32 = arith.constant 0 : i32
    %c0_i32_0 = arith.constant 0 : i32
    %c0_i32_1 = arith.constant 0 : i32
    return %c0_i32, %c0_i32_0 : i32, i32
  }
  func.func @transform_6(%arg0: i32) -> (i32, i32) {
    %c0_i32 = arith.constant 0 : i32
    %c0_i32_0 = arith.constant 0 : i32
    %c0_i32_1 = arith.constant 0 : i32
    return %c0_i32, %c0_i32_0 : i32, i32
  }
  func.func @transform_7(%arg0: i32) -> (i32, i32) {
    %c0_i32 = arith.constant 0 : i32
    %c0_i32_0 = arith.constant 0 : i32
    return %arg0, %c0_i32 : i32, i32
  }
}

</mosaic_0001>

<bundles_post_ra>
// kernel: actor_forward.1
= control target key start
LH: loop header
LB: loop body
LE: loop exit
PB: predicated region body
PF: predicated region fallthrough
CT: control target
= control target key end

     0   :  { %v523_v3 = vmov 0.0|0.0   ;;  %vm524_vm0 = vmmov 0   ;;  %v525_v6 = vmov 0.0   ;;  %s720_s0 = inlined_call_operand.vmem [shape: f32[8,32], index: 0, kind: input, shape index: {}]   ;;  %s721_s1 = inlined_call_operand.vmem [shape: f32[32,128], index: 1, kind: input, shape index: {}]   ;;  %s722_s2 = inlined_call_operand.vmem [shape: f32[1,128], index: 2, kind: input, shape index: {}]   ;;  %s723_s3 = inlined_call_operand.vmem [shape: f32[128,128], index: 3, kind: input, shape index: {}]   ;;  %s724_s4 = inlined_call_operand.vmem [shape: f32[1,128], index: 4, kind: input, shape index: {}]   ;;  %s725_s5 = inlined_call_operand.vmem [shape: f32[128,8], index: 5, kind: input, shape index: {}]   ;;  %s726_s6 = inlined_call_operand.vmem [shape: f32[1,8], index: 6, kind: input, shape index: {}]   ;;  %s727_s7 = inlined_call_operand.hbm [shape: f32[8,8], index: 7, kind: output, shape index: {}]  }
   0x1   :  { %v28_v0 = vld [vmem:[%s721_s1] sm:$0xff]  ;;  %v29_v1 = vld [vmem:[%s721_s1 + $0x8] sm:$0xff]  ;;  %v30_v2 = vld [vmem:[%s721_s1 + $0x10] sm:$0xff]  ;;  %441 = vmatprep.subr.bf16.mxu0 %v523_v3  ;;  %368 = vmatprep.mubr.msk.f32.mxu0 %vm524_vm0, %v525_v6 }
   0x2   :  { %v442_v4 = vpack.c.bf16 %v29_v1, %v28_v0  ;;  %v31_v5 = vld [vmem:[%s721_s1 + $0x18] sm:$0xff]  ;;  %v114_v7 = vld [vmem:[%s723_s3] sm:$0xff]  ;;  %447 = vmatprep.subr.bf16.mxu1 %v523_v3  ;;  %v115_v8 = vld [vmem:[%s723_s3 + $0x8] sm:$0xff]  ;;  %403 = vmatprep.mubr.msk.f32.mxu1 %vm524_vm0, %v525_v6 }
   0x3   :  { %v116_v9 = vld [vmem:[%s723_s3 + $0x10] sm:$0xff]  ;;  %v117_v10 = vld [vmem:[%s723_s3 + $0x18] sm:$0xff]  ;;  %v445_v11 = vpack.c.bf16 %v31_v5, %v30_v2  ;;  %v448_v12 = vpack.c.bf16 %v115_v8, %v114_v7  ;;  %v118_v14 = vld [vmem:[%s723_s3 + $0x20] sm:$0xff] }
   0x4   :  { %443 = vmatpush3.bf16.msra.mxu0 %v442_v4  ;;  %v451_v13 = vpack.c.bf16 %v117_v10, %v116_v9  ;;  %v119_v15 = vld [vmem:[%s723_s3 + $0x28] sm:$0xff] }
   0x5   :  { %444 = vmatprep.subr.bf16.mxu0 %v523_v3  ;;  %449 = vmatpush3.bf16.msra.mxu1 %v448_v12 }
   0x6   :  { %450 = vmatprep.subr.bf16.mxu1 %v523_v3 }
   0x7   :  { %12 = vsyncpa [#allocation3], 0  ;;  %v27_v16 = vld [vmem:[%s720_s0] sm:$0xff]  ;;  %vm39_vm1 = vcmask 261120   ;;  %v454_v17 = vpack.c.bf16 %v119_v15, %v118_v14  ;;  %v120_v18 = vld [vmem:[%s723_s3 + $0x30] sm:$0xff]  ;;  %s526_s26 = smov [#allocation2]  }
   0x8   :  { %446 = vmatpush3.bf16.msra.mxu0 %v445_v11  ;;  %v121_v19 = vld [vmem:[%s723_s3 + $0x38] sm:$0xff]  ;;  %v122_v21 = vld [vmem:[%s723_s3 + $0x40] sm:$0xff]  ;;  %v123_v22 = vld [vmem:[%s723_s3 + $0x48] sm:$0xff]  ;;  %s309_s27 = sshll.u32 %s526_s26, 4  ;;  %vm301_vm2 = vcmask 64512   ;;  %s310_s27 = int_to_ptr.vmem [resolvable:$true] %s309_s27 }
   0x9   :  { %471 = vmatprep.subr.bf16.mxu0 %v523_v3  ;;  %452 = vmatpush3.bf16.msra.mxu1 %v451_v13  ;;  %v457_v20 = vpack.c.bf16 %v121_v19, %v120_v18  ;;  %v460_v23 = vpack.c.bf16 %v123_v22, %v122_v21  ;;  %v124_v24 = vld [vmem:[%s723_s3 + $0x50] sm:$0xff]  ;;  %v125_v25 = vld [vmem:[%s723_s3 + $0x58] sm:$0xff]  ;;  %v126_v27 = vld [vmem:[%s723_s3 + $0x60] sm:$0xff]  ;;  %p504_p1 = scmp.lt.s32.totalorder %s310_s27, %s310_s27 }
   0xa   :  { %453 = vmatprep.subr.bf16.mxu1 %v523_v3  ;;  %v463_v26 = vpack.c.bf16 %v125_v25, %v124_v24  ;;  %v127_v28 = vld [vmem:[%s723_s3 + $0x68] sm:$0xff]  ;;  %v128_v30 = vld [vmem:[%s723_s3 + $0x70] sm:$0xff]  ;;  %v129_v31 = vld [vmem:[%s723_s3 + $0x78] sm:$0xff] }
   0xb   :  { %369 = vmatmul.mubr.msk.f32.vlgmr.msra.gmra.mrb[0].mxu0 %vm39_vm1, %v27_v16  ;;  %v466_v29 = vpack.c.bf16 %v127_v28, %v126_v27  ;;  %v469_v32 = vpack.c.bf16 %v129_v31, %v128_v30  ;;  %v208_v33 = vld [vmem:[%s725_s5] sm:$0xff]  ;;  %v209_v34 = vld [vmem:[%s725_s5 + $0x8] sm:$0xff]  ;;  %v210_v35 = vld [vmem:[%s725_s5 + $0x10] sm:$0xff] }
   0xc   :  { %438 = vmatprep.mubr.msk.f32.mxu0 %vm524_vm0, %v525_v6  ;;  %v472_v36 = vpack.c.bf16 %v209_v34, %v208_v33  ;;  %v211_v37 = vld [vmem:[%s725_s5 + $0x18] sm:$0xff]  ;;  %v212_v39 = vld [vmem:[%s725_s5 + $0x20] sm:$0xff]  ;;  %v213_v40 = vld [vmem:[%s725_s5 + $0x28] sm:$0xff] }
   0xd   :  { %455 = vmatpush3.bf16.msra.mxu1 %v454_v17  ;;  %v475_v38 = vpack.c.bf16 %v211_v37, %v210_v35  ;;  %v478_v41 = vpack.c.bf16 %v213_v40, %v212_v39  ;;  %v214_v42 = vld [vmem:[%s725_s5 + $0x30] sm:$0xff]  ;;  %v215_v43 = vld [vmem:[%s725_s5 + $0x38] sm:$0xff]  ;;  %v216_v45 = vld [vmem:[%s725_s5 + $0x40] sm:$0xff] }
   0xe   :  { %456 = vmatprep.subr.bf16.mxu1 %v523_v3  ;;  %473 = vmatpush3.bf16.msra.mxu0 %v472_v36  ;;  %v481_v44 = vpack.c.bf16 %v215_v43, %v214_v42  ;;  %v217_v46 = vld [vmem:[%s725_s5 + $0x48] sm:$0xff]  ;;  %v218_v48 = vld [vmem:[%s725_s5 + $0x50] sm:$0xff]  ;;  %v219_v49 = vld [vmem:[%s725_s5 + $0x58] sm:$0xff] }
   0xf   :  { %474 = vmatprep.subr.bf16.mxu0 %v523_v3  ;;  %v484_v47 = vpack.c.bf16 %v217_v46, %v216_v45  ;;  %v487_v50 = vpack.c.bf16 %v219_v49, %v218_v48  ;;  %v220_v51 = vld [vmem:[%s725_s5 + $0x60] sm:$0xff]  ;;  %v221_v52 = vld [vmem:[%s725_s5 + $0x68] sm:$0xff]  ;;  %v222_v59 = vld [vmem:[%s725_s5 + $0x70] sm:$0xff] }
  0x10   :  { %v490_v53 = vpack.c.bf16 %v221_v52, %v220_v51  ;;  %v317_v54 = vld [vmem:[%s722_s2] ss:$0 sm:$0xff]  ;;  %v223_v60 = vld [vmem:[%s725_s5 + $0x78] sm:$0xff]  ;;  %s499_s5 = scalar_lea.vmem %s310_s27, 128 }
  0x11   :  { %458 = vmatpush3.bf16.msra.mxu1 %v457_v20  ;;  %v493_v61 = vpack.c.bf16 %v223_v60, %v222_v59  ;;  %v319_v62 = vld [vmem:[%s724_s4] ss:$0 sm:$0xff]  ;;  %p500_p0 = scmp.ne.s32.totalorder %s310_s27, %s499_s5  ;;  %p505_p2 = scmp.lt.s32.totalorder %s499_s5, %s499_s5 }
  0x12   :  { %459 = vmatprep.subr.bf16.mxu1 %v523_v3  ;;  %476 = vmatpush3.bf16.msra.mxu0 %v475_v38 }
  0x13   :  { %477 = vmatprep.subr.bf16.mxu0 %v523_v3  ;;  %p506_p3 = por %p505_p2, %p504_p1 }
  0x15   :  { %461 = vmatpush3.bf16.msra.mxu1 %v460_v23  ;;  %p507_p4 = pnand %p506_p3, %p500_p0 }
  0x16   :  { %462 = vmatprep.subr.bf16.mxu1 %v523_v3  ;;  %479 = vmatpush3.bf16.msra.mxu0 %v478_v41 }
  0x17   :  { %480 = vmatprep.subr.bf16.mxu0 %v523_v3 }
  0x19   :  { %464 = vmatpush3.bf16.msra.mxu1 %v463_v26 }
  0x1a   :  { %465 = vmatprep.subr.bf16.mxu1 %v523_v3  ;;  %482 = vmatpush3.bf16.msra.mxu0 %v481_v44 }
  0x1b   :  { %483 = vmatprep.subr.bf16.mxu0 %v523_v3 }
  0x1d   :  { %467 = vmatpush3.bf16.msra.mxu1 %v466_v29 }
  0x1e   :  { %468 = vmatprep.subr.bf16.mxu1 %v523_v3  ;;  %485 = vmatpush3.bf16.msra.mxu0 %v484_v47 }
  0x1f   :  { %486 = vmatprep.subr.bf16.mxu0 %v523_v3 }
  0x21   :  { %470 = vmatpush3.bf16.msra.mxu1 %v469_v32 }
  0x22   :  { %488 = vmatpush3.bf16.msra.mxu0 %v487_v50 }
  0x23   :  { %489 = vmatprep.subr.bf16.mxu0 %v523_v3 }
  0x26   :  { %491 = vmatpush3.bf16.msra.mxu0 %v490_v53 }
  0x27   :  { %492 = vmatprep.subr.bf16.mxu0 %v523_v3  ;;  %v320_v3 = vld [vmem:[%s726_s6] ss:$0 sm:$0xff] }
  0x2a   :  { %494 = vmatpush3.bf16.msra.mxu0 %v493_v61 }
  0xde   :  { %v109_v55 = vpop.f32.mrb[0].mxu0 }
  0xdf   :  { %v110_v56 = vadd.f32 %v317_v54, %v109_v55  ;;  %v370_v57 = vpop.f32.mrb[1].mxu0 }
  0xe1   :  { %v113_v58 = vmax.f32 %v110_v56, 0.0 }
  0xe3   :  { %404 = vmatmul.mubr.f32.vlgmr.msra.gmra.mrb[0].mxu1 %v113_v58 }
 0x1b6   :  { %v203_v63 = vpop.f32.mrb[0].mxu1 }
 0x1b7   :  { %v204_v0 = vadd.f32 %v319_v62, %v203_v63  ;;  %v405_v1 = vpop.f32.mrb[1].mxu1 }
 0x1b9   :  { %v207_v2 = vmax.f32 %v204_v0, 0.0 }
 0x1bb   :  { %439 = vmatmul.mubr.f32.vlgmr.msra.gmra.mrb[2].mxu0 %v207_v2 }
 0x28e   :  { %v297_v4 = vpop.f32.mrb[2].mxu0 }
 0x28f   :  { %v298_v5 = vadd.f32 %v320_v3, %v297_v4  ;;  %v440_v6 = vpop.f32.mrb[3].mxu0 }
 0x291   :  { %302 = vst.msk [vmem:[#allocation2] sm:$0xff] %vm301_vm2, %v298_v5 }
 0x292   :  { %510 = shalt.err (!%p507_p4)
}
 0x293   :  { %s511_s29 = scalar_lea.hbm %s727_s7, 128 }
 0x294   :  { %p512_p5 = scmp.ne.s32.totalorder %s727_s7, %s511_s29  ;;  %p515_p6 = scmp.lt.u32.totalorder %s511_s29, %s727_s7 }
 0x296   :  { %p517_p7 = pnand %p515_p6, %p512_p5 }
 0x298   :  { %520 = shalt.err (!%p517_p7)
}
 0x299   :  { %312 = dma.vmem_to_hbm [thread:$0]  %s310_s27, 128, %s727_s7, [#allocation3]  }
 0x29a   :  { %521 = dma.done.wait [#allocation3], 128  }
 0x29b   :  { %522 = vsyncadd [#allocation3], 4294967168 }
 0x29c   :  { %316 = vsyncpa [#allocation3], 1 }

</bundles_post_ra>
